<compile_context>
chip_gen: v7x
topology: tpu7x:2x2x1
jax: 0.10.0
libtpu: 0.0.40
codegen_flags: <defaults>
</compile_context>

<pallas_src>
import jax
import jax.numpy as jnp
from jax.experimental import pallas as pl
from jax.experimental.pallas import tpu as pltpu

LANE = 128  # TPU lane width


def _round_up(n, m):
    return ((n + m - 1) // m) * m


def _pad2(a, rows, cols):
    r, c = a.shape
    return jnp.pad(a, ((0, rows - r), (0, cols - c)))


def mlp_kernel(x_ref, w1_ref, b1_ref, w2_ref, b2_ref,
               w3_ref, b3_ref, w4_ref, b4_ref, o_ref):
    # Layer 1: Linear (bf16 MXU, f32 accum) + bias + ReLU.  dropout1 == identity (eval).
    h = jnp.dot(x_ref[...], w1_ref[...], preferred_element_type=jnp.float32)
    h = jnp.maximum(h + b1_ref[...], 0.0).astype(jnp.bfloat16)
    # Layer 2: Linear + ReLU.  dropout2 == identity (eval).
    h = jnp.dot(h, w2_ref[...], preferred_element_type=jnp.float32)
    h = jnp.maximum(h + b2_ref[...], 0.0).astype(jnp.bfloat16)
    # Layer 3: Linear + ReLU.  dropout3 == identity (eval).
    h = jnp.dot(h, w3_ref[...], preferred_element_type=jnp.float32)
    h = jnp.maximum(h + b3_ref[...], 0.0).astype(jnp.bfloat16)
    # Output layer: Linear, no activation.  Lane-dense f32 store.
    out = jnp.dot(h, w4_ref[...], preferred_element_type=jnp.float32) + b4_ref[...]
    o_ref[...] = out.astype(o_ref.dtype)


def mlp_classifier_forward(x, params, *, batch_tile=None):
    """Fused 4-layer MLP forward. x: [B, input_dim] float32. Returns [B, output_dim] f32."""
    (w1, b1), (w2, b2), (w3, b3), (w4, b4) = params
    B, d_in = x.shape
    d_h = w1.shape[1]
    d_out = w4.shape[1]

    # Lane-dense padding of every feature dimension.
    D_in = _round_up(d_in, LANE)
    D_h = _round_up(d_h, LANE)
    D_out = _round_up(d_out, LANE)

    # Batch tiling: big tiles amortize per-step overhead; always >= 2 programs
    # so the "parallel" grid axis can shard across v7x's two TensorCores.
    if batch_tile is None:
        batch_tile = min(512, max(16, _round_up(pl.cdiv(B, 2), 16)))
    else:
        assert batch_tile % 8 == 0, "batch_tile must be a multiple of 8"
    tb = batch_tile
    B_pad = _round_up(B, tb)
    if B_pad // tb < 2:
        B_pad = 2 * tb
    grid = (B_pad // tb,)

    # Operand prep: zero-pad, bf16 inputs/weights (f32 biases for the f32 accum path).
    cdt = jnp.bfloat16
    xp = _pad2(x, B_pad, D_in).astype(cdt)
    w1p = _pad2(w1, D_in, D_h).astype(cdt)
    w2p = _pad2(w2, D_h, D_h).astype(cdt)
    w3p = _pad2(w3, D_h, D_h).astype(cdt)
    w4p = _pad2(w4, D_h, D_out).astype(cdt)
    b1p = _pad2(b1.reshape(1, -1), 1, D_h).astype(jnp.float32)
    b2p = _pad2(b2.reshape(1, -1), 1, D_h).astype(jnp.float32)
    b3p = _pad2(b3.reshape(1, -1), 1, D_h).astype(jnp.float32)
    b4p = _pad2(b4.reshape(1, -1), 1, D_out).astype(jnp.float32)

    def const_spec(shape):
        # Grid-invariant operand: single-buffer it (no point double-buffering
        # something that never changes; halves its VMEM footprint).
        return pl.BlockSpec(shape, lambda i: (0, 0), pipeline_mode=pl.Buffered(1))

    flops = 2 * B_pad * (D_in * D_h + 2 * D_h * D_h + D_h * D_out)
    bytes_accessed = (
        xp.size * xp.dtype.itemsize
        + sum(w.size * w.dtype.itemsize for w in (w1p, w2p, w3p, w4p))
        + sum(b.size * b.dtype.itemsize for b in (b1p, b2p, b3p, b4p))
        + B_pad * D_out * 4
    )
    cost = pl.CostEstimate(flops=flops, transcendentals=0,
                           bytes_accessed=bytes_accessed)

    out = pl.pallas_call(
        mlp_kernel,
        out_shape=jax.ShapeDtypeStruct((B_pad, D_out), jnp.float32),
        grid_spec=pltpu.PrefetchScalarGridSpec(
            num_scalar_prefetch=0,
            grid=grid,
            in_specs=[
                pl.BlockSpec((tb, D_in), lambda i: (i, 0)),    # x tile (pipelined)
                const_spec((D_in, D_h)), const_spec((1, D_h)),  # layer 1
                const_spec((D_h, D_h)), const_spec((1, D_h)),   # layer 2
                const_spec((D_h, D_h)), const_spec((1, D_h)),   # layer 3
                const_spec((D_h, D_out)), const_spec((1, D_out)),  # output layer
            ],
            out_specs=pl.BlockSpec((tb, D_out), lambda i: (i, 0)),
        ),
        compiler_params=pltpu.CompilerParams(
            dimension_semantics=("parallel",)),
        cost_estimate=cost,
    )(xp, w1p, b1p, w2p, b2p, w3p, b3p, w4p, b4p)

    # Strip batch and lane padding.
    return out[:B, :d_out]


def init_linear(key, fan_in, fan_out):
    """PyTorch nn.Linear default init: U(-1/sqrt(fan_in), 1/sqrt(fan_in)).
    Returns weight already transposed to [fan_in, fan_out]."""
    kw, kb = jax.random.split(key)
    bound = 1.0 / jnp.sqrt(jnp.float32(fan_in))
    w = jax.random.uniform(kw, (fan_in, fan_out), jnp.float32, -bound, bound)
    b = jax.random.uniform(kb, (fan_out,), jnp.float32, -bound, bound)
    return w, b


def reference_forward(x, params, compute_dtype=jnp.float32):
    """Plain-JAX reference. compute_dtype=bf16 mirrors the kernel's cast scheme."""
    (w1, b1), (w2, b2), (w3, b3), (w4, b4) = params

    def dense(h, w, b, relu):
        y = jnp.dot(h.astype(compute_dtype), w.astype(compute_dtype),
                    preferred_element_type=jnp.float32) + b
        if relu:
            y = jnp.maximum(y, 0.0).astype(compute_dtype)
        return y

    h = dense(x, w1, b1, True)
    h = dense(h, w2, b2, True)
    h = dense(h, w3, b3, True)
    return dense(h, w4, b4, False).astype(jnp.float32)


if __name__ == "__main__":
    key = jax.random.PRNGKey(0)
    kx, k1, k2, k3, k4 = jax.random.split(key, 5)

    # Small shapes consistent with the module.
    batch, input_dim, hidden_dim, output_dim = 8, 64, 32, 16

    x = jax.random.normal(kx, (batch, input_dim), jnp.float32)
    params = (
        init_linear(k1, input_dim, hidden_dim),
        init_linear(k2, hidden_dim, hidden_dim),
        init_linear(k3, hidden_dim, hidden_dim),
        init_linear(k4, hidden_dim, output_dim),
    )

    out = jax.block_until_ready(mlp_classifier_forward(x, params))
    assert out.shape == (batch, output_dim)

    # Tight check against a reference using the same bf16/f32 mixed precision.
    ref_bf16 = reference_forward(x, params, compute_dtype=jnp.bfloat16)
    assert jnp.allclose(out, ref_bf16, atol=1e-3, rtol=1e-3), "mismatch vs bf16 reference"

    # Loose sanity check against the pure-f32 reference (bf16 rounding only).
    ref_f32 = reference_forward(x, params, compute_dtype=jnp.float32)
    assert jnp.allclose(out, ref_f32, atol=5e-2, rtol=5e-2), "mismatch vs f32 reference"

    print("KERNEL_OK")
</pallas_src>

<mosaic_0001>
module attributes {stable_mosaic.version = 11 : i64} {
  func.func @mlp_kernel(%arg0: i32, %arg1: memref<16x128xbf16, #tpu.memory_space<vmem>>, %arg2: memref<128x128xbf16, #tpu.memory_space<vmem>>, %arg3: memref<1x128xf32, #tpu.memory_space<vmem>>, %arg4: memref<128x128xbf16, #tpu.memory_space<vmem>>, %arg5: memref<1x128xf32, #tpu.memory_space<vmem>>, %arg6: memref<128x128xbf16, #tpu.memory_space<vmem>>, %arg7: memref<1x128xf32, #tpu.memory_space<vmem>>, %arg8: memref<128x128xbf16, #tpu.memory_space<vmem>>, %arg9: memref<1x128xf32, #tpu.memory_space<vmem>>, %arg10: memref<16x128xf32, #tpu.memory_space<vmem>>) attributes {dimension_semantics = [#tpu.dimension_semantics<parallel>], iteration_bounds = array<i64: 2>, scalar_prefetch = 0 : i64, scratch_operands = 0 : i64, tpu.core_type = #tpu.core_type<tc>, window_params = [{transform_indices = @transform_0, window_bounds = array<i64: 16, 128>}, {pipeline_mode = #tpu.pipeline_mode<synchronous>, transform_indices = @transform_1, window_bounds = array<i64: 128, 128>}, {pipeline_mode = #tpu.pipeline_mode<synchronous>, transform_indices = @transform_2, window_bounds = array<i64: 1, 128>}, {pipeline_mode = #tpu.pipeline_mode<synchronous>, transform_indices = @transform_3, window_bounds = array<i64: 128, 128>}, {pipeline_mode = #tpu.pipeline_mode<synchronous>, transform_indices = @transform_4, window_bounds = array<i64: 1, 128>}, {pipeline_mode = #tpu.pipeline_mode<synchronous>, transform_indices = @transform_5, window_bounds = array<i64: 128, 128>}, {pipeline_mode = #tpu.pipeline_mode<synchronous>, transform_indices = @transform_6, window_bounds = array<i64: 1, 128>}, {pipeline_mode = #tpu.pipeline_mode<synchronous>, transform_indices = @transform_7, window_bounds = array<i64: 128, 128>}, {pipeline_mode = #tpu.pipeline_mode<synchronous>, transform_indices = @transform_8, window_bounds = array<i64: 1, 128>}, {transform_indices = @transform_9, window_bounds = array<i64: 16, 128>}]} {
    %c0 = arith.constant 0 : index
    %c0_0 = arith.constant 0 : index
    %0 = vector.load %arg1[%c0, %c0_0] : memref<16x128xbf16, #tpu.memory_space<vmem>>, vector<16x128xbf16>
    %c0_1 = arith.constant 0 : index
    %c0_2 = arith.constant 0 : index
    %1 = vector.load %arg2[%c0_1, %c0_2] : memref<128x128xbf16, #tpu.memory_space<vmem>>, vector<128x128xbf16>
    %cst = arith.constant dense<0.000000e+00> : vector<16x128xf32>
    %2 = tpu.matmul %0, %1, %cst {dimension_numbers = #tpu.dot_dimension_numbers<[1], [0], [0], [1], [0, 0, 1, 1], [], []>} : vector<16x128xbf16>, vector<128x128xbf16>, vector<16x128xf32> -> vector<16x128xf32>
    %c0_3 = arith.constant 0 : index
    %c0_4 = arith.constant 0 : index
    %3 = vector.load %arg3[%c0_3, %c0_4] : memref<1x128xf32, #tpu.memory_space<vmem>>, vector<1x128xf32>
    %4 = vector.broadcast %3 : vector<1x128xf32> to vector<16x128xf32>
    %5 = arith.addf %2, %4 : vector<16x128xf32>
    %cst_5 = arith.constant 0.000000e+00 : f32
    %6 = vector.broadcast %cst_5 : f32 to vector<16x128xf32>
    %7 = arith.maximumf %5, %6 : vector<16x128xf32>
    %8 = arith.truncf %7 : vector<16x128xf32> to vector<16x128xbf16>
    %c0_6 = arith.constant 0 : index
    %c0_7 = arith.constant 0 : index
    %9 = vector.load %arg4[%c0_6, %c0_7] : memref<128x128xbf16, #tpu.memory_space<vmem>>, vector<128x128xbf16>
    %cst_8 = arith.constant dense<0.000000e+00> : vector<16x128xf32>
    %10 = tpu.matmul %8, %9, %cst_8 {dimension_numbers = #tpu.dot_dimension_numbers<[1], [0], [0], [1], [0, 0, 1, 1], [], []>} : vector<16x128xbf16>, vector<128x128xbf16>, vector<16x128xf32> -> vector<16x128xf32>
    %c0_9 = arith.constant 0 : index
    %c0_10 = arith.constant 0 : index
    %11 = vector.load %arg5[%c0_9, %c0_10] : memref<1x128xf32, #tpu.memory_space<vmem>>, vector<1x128xf32>
    %12 = vector.broadcast %11 : vector<1x128xf32> to vector<16x128xf32>
    %13 = arith.addf %10, %12 : vector<16x128xf32>
    %cst_11 = arith.constant 0.000000e+00 : f32
    %14 = vector.broadcast %cst_11 : f32 to vector<16x128xf32>
    %15 = arith.maximumf %13, %14 : vector<16x128xf32>
    %16 = arith.truncf %15 : vector<16x128xf32> to vector<16x128xbf16>
    %c0_12 = arith.constant 0 : index
    %c0_13 = arith.constant 0 : index
    %17 = vector.load %arg6[%c0_12, %c0_13] : memref<128x128xbf16, #tpu.memory_space<vmem>>, vector<128x128xbf16>
    %cst_14 = arith.constant dense<0.000000e+00> : vector<16x128xf32>
    %18 = tpu.matmul %16, %17, %cst_14 {dimension_numbers = #tpu.dot_dimension_numbers<[1], [0], [0], [1], [0, 0, 1, 1], [], []>} : vector<16x128xbf16>, vector<128x128xbf16>, vector<16x128xf32> -> vector<16x128xf32>
    %c0_15 = arith.constant 0 : index
    %c0_16 = arith.constant 0 : index
    %19 = vector.load %arg7[%c0_15, %c0_16] : memref<1x128xf32, #tpu.memory_space<vmem>>, vector<1x128xf32>
    %20 = vector.broadcast %19 : vector<1x128xf32> to vector<16x128xf32>
    %21 = arith.addf %18, %20 : vector<16x128xf32>
    %cst_17 = arith.constant 0.000000e+00 : f32
    %22 = vector.broadcast %cst_17 : f32 to vector<16x128xf32>
    %23 = arith.maximumf %21, %22 : vector<16x128xf32>
    %24 = arith.truncf %23 : vector<16x128xf32> to vector<16x128xbf16>
    %c0_18 = arith.constant 0 : index
    %c0_19 = arith.constant 0 : index
    %25 = vector.load %arg8[%c0_18, %c0_19] : memref<128x128xbf16, #tpu.memory_space<vmem>>, vector<128x128xbf16>
    %cst_20 = arith.constant dense<0.000000e+00> : vector<16x128xf32>
    %26 = tpu.matmul %24, %25, %cst_20 {dimension_numbers = #tpu.dot_dimension_numbers<[1], [0], [0], [1], [0, 0, 1, 1], [], []>} : vector<16x128xbf16>, vector<128x128xbf16>, vector<16x128xf32> -> vector<16x128xf32>
    %c0_21 = arith.constant 0 : index
    %c0_22 = arith.constant 0 : index
    %27 = vector.load %arg9[%c0_21, %c0_22] : memref<1x128xf32, #tpu.memory_space<vmem>>, vector<1x128xf32>
    %28 = vector.broadcast %27 : vector<1x128xf32> to vector<16x128xf32>
    %29 = arith.addf %26, %28 : vector<16x128xf32>
    %c0_23 = arith.constant 0 : index
    %c0_24 = arith.constant 0 : index
    %30 = vector.load %arg10[%c0_23, %c0_24] : memref<16x128xf32, #tpu.memory_space<vmem>>, vector<16x128xf32>
    tpu.vector_store %arg10[%c0_23, %c0_24], %29 {strides = array<i32>} : memref<16x128xf32, #tpu.memory_space<vmem>>, vector<16x128xf32>,
    return
  }
  func.func @transform_0(%arg0: i32) -> (i32, i32) {
    %c0_i32 = arith.constant 0 : i32
    %c0_i32_0 = arith.constant 0 : i32
    return %arg0, %c0_i32 : i32, i32
  }
  func.func @transform_1(%arg0: i32) -> (i32, i32) {
    %c0_i32 = arith.constant 0 : i32
    %c0_i32_0 = arith.constant 0 : i32
    %c0_i32_1 = arith.constant 0 : i32
    return %c0_i32, %c0_i32_0 : i32, i32
  }
  func.func @transform_2(%arg0: i32) -> (i32, i32) {
    %c0_i32 = arith.constant 0 : i32
    %c0_i32_0 = arith.constant 0 : i32
    %c0_i32_1 = arith.constant 0 : i32
    return %c0_i32, %c0_i32_0 : i32, i32
  }
  func.func @transform_3(%arg0: i32) -> (i32, i32) {
    %c0_i32 = arith.constant 0 : i32
    %c0_i32_0 = arith.constant 0 : i32
    %c0_i32_1 = arith.constant 0 : i32
    return %c0_i32, %c0_i32_0 : i32, i32
  }
  func.func @transform_4(%arg0: i32) -> (i32, i32) {
    %c0_i32 = arith.constant 0 : i32
    %c0_i32_0 = arith.constant 0 : i32
    %c0_i32_1 = arith.constant 0 : i32
    return %c0_i32, %c0_i32_0 : i32, i32
  }
  func.func @transform_5(%arg0: i32) -> (i32, i32) {
    %c0_i32 = arith.constant 0 : i32
    %c0_i32_0 = arith.constant 0 : i32
    %c0_i32_1 = arith.constant 0 : i32
    return %c0_i32, %c0_i32_0 : i32, i32
  }
  func.func @transform_6(%arg0: i32) -> (i32, i32) {
    %c0_i32 = arith.constant 0 : i32
    %c0_i32_0 = arith.constant 0 : i32
    %c0_i32_1 = arith.constant 0 : i32
    return %c0_i32, %c0_i32_0 : i32, i32
  }
  func.func @transform_7(%arg0: i32) -> (i32, i32) {
    %c0_i32 = arith.constant 0 : i32
    %c0_i32_0 = arith.constant 0 : i32
    %c0_i32_1 = arith.constant 0 : i32
    return %c0_i32, %c0_i32_0 : i32, i32
  }
  func.func @transform_8(%arg0: i32) -> (i32, i32) {
    %c0_i32 = arith.constant 0 : i32
    %c0_i32_0 = arith.constant 0 : i32
    %c0_i32_1 = arith.constant 0 : i32
    return %c0_i32, %c0_i32_0 : i32, i32
  }
  func.func @transform_9(%arg0: i32) -> (i32, i32) {
    %c0_i32 = arith.constant 0 : i32
    %c0_i32_0 = arith.constant 0 : i32
    return %arg0, %c0_i32 : i32, i32
  }
}

</mosaic_0001>

<bundles_post_ra>
// kernel: tpu_custom_call.1
= control target key start
LH: loop header
LB: loop body
LE: loop exit
PB: predicated region body
PF: predicated region fallthrough
CT: control target
= control target key end

     0   :  { %s1935_s0 = inlined_call_operand.hbm [shape: bf16[32,128], index: 0, kind: input, shape index: {}]   ;;  %s1936_s1 = inlined_call_operand.hbm [shape: bf16[128,128], index: 1, kind: input, shape index: {}]   ;;  %s1937_s2 = inlined_call_operand.vmem [shape: f32[1,128], index: 2, kind: input, shape index: {}]   ;;  %s1938_s3 = inlined_call_operand.hbm [shape: bf16[128,128], index: 3, kind: input, shape index: {}]   ;;  %s1939_s4 = inlined_call_operand.vmem [shape: f32[1,128], index: 4, kind: input, shape index: {}]   ;;  %s1940_s5 = inlined_call_operand.hbm [shape: bf16[128,128], index: 5, kind: input, shape index: {}]   ;;  %s1941_s6 = inlined_call_operand.vmem [shape: f32[1,128], index: 6, kind: input, shape index: {}]   ;;  %s1942_s7 = inlined_call_operand.hbm [shape: bf16[128,128], index: 7, kind: input, shape index: {}]   ;;  %s1943_s8 = inlined_call_operand.vmem [shape: f32[1,128], index: 8, kind: input, shape index: {}]   ;;  %s1944_s9 = inlined_call_operand.hbm [shape: f32[32,128], index: 9, kind: output, shape index: {}]  }
   0x1   :  { %1951 = sst [smem:[#allocation18_spill]] %s1944_s9 }
   0x2   :  { %14 = vsyncpa [#allocation3], 0 }
   0x3   :  { %16 = vsyncpa [#allocation3 + $0x1], 0 }
   0x4   :  { %17 = vsyncpa [#allocation6], 0 }
   0x5   :  { %18 = vsyncpa [#allocation9], 0 }
   0x6   :  { %19 = vsyncpa [#allocation4], 0 }
   0x7   :  { %21 = vsyncpa [#allocation4 + $0x1], 0  ;;  %s1587_s30 = smov 0   ;;  %s1589_s10 = smov 0  }
   0x8   :  { %s1591_s11 = smov 0   ;;  %s1593_s12 = smov 0  }
   0x9 LB: > { %1952 = sst [smem:[#allocation16_spill]] %s1511_s30  ;;  %s1608_s13 = sadd.s32 4294967295, %s1523_s12   ;;  %s1523_s12 = sphi %s1593_s12, %s1976_s12   ;;  %s1519_s11 = sphi %s1591_s11, %s1975_s11   ;;  %s1515_s10 = sphi %s1589_s10, %s1974_s10   ;;  %s1511_s30 = sphi %s1587_s30, %s1973_s30  }
   0xa   : > { %s1004_s14 = sadd.s32 4294967294, %s1523_s12   ;;  %p47_p0 = scmp.ne.s32.totalorder %s1515_s10, %s1511_s30 }
   0xb   : > { %p1945_p1 = scmp.eq.s32.totalorder %s1608_s13, 0  ;;  %p245_p3 = scmp.eq.s32.totalorder %s1004_s14, 1 }
   0xc   : > { %p1005_p5 = scmp.ge.s32.totalorder %s1523_s12, 1  ;;  %p252_p7 = scmp.lt.s32.totalorder %s1523_s12, 3 }
   0xd   : > { %p1617_p4 = por %p1945_p1, %p47_p0  ;;  %p1622_p6 = por %p245_p3, %p47_p0 }
   0xe   : > { %p1627_p8 = pnand %p1005_p5, %p252_p7  ;;  %s1525_s18 = smov [#allocation5]  }
   0xf   : > { %s1953_s15 = scalar_select %p1617_p4, 1, 0 }
  0x10   : > { %s1954_s16 = scalar_select %p1622_p6, 1, 0 }
  0x11   : > { %s1956_s17 = scalar_select %p1627_p8, 1, 0 }
  0x12   : > { %1955 = sst [smem:[#allocation17_spill]] %s1954_s16  ;;  %s264_s19 = sshll.u32 %s1525_s18, 4  ;;  %s1631_s19 = int_to_ptr.vmem [resolvable:$true] %s264_s19 }
  0x13   : > { %p1201_p9 = pneg %p1627_p8  ;;  %s1526_s21 = smov [#allocation8]  }
  0x14   : > { %s296_s22 = sshll.u32 %s1526_s21, 4  ;;  %s1527_s23 = smov [#allocation7]   ;;  %s1642_s22 = int_to_ptr.vmem [resolvable:$true] %s296_s22 }
  0x15   : > { %p1638_p11 = pnand %p1201_p9, %p1945_p1  ;;  %s1644_s24 = sshll.u32 %s1527_s23, 4  ;;  %s281_s24 = int_to_ptr.vmem [resolvable:$true] %s1644_s24 }
  0x16   : > { %s1307_s27 = scalar_lea.hbm %s1936_s1, 1024 }
  0x17   : > { %p1308_p12 = scmp.ne.s32.totalorder %s1936_s1, %s1307_s27  ;;  %p1654_p13 = pneg %p1638_p11 }
  0x18   : > { %p1314_p5 = scmp.lt.u32.totalorder %s1307_s27, %s1936_s1 }
  0x19   : > { %p1310_p0 = pnand %p1654_p13, %p1308_p12 }
  0x1b   : > { %p1311_p3 = pneg %p1310_p0 }
  0x1d   : > { %p1316_p7 = pnand %p1314_p5, %p1311_p3 }
  0x1f   : > { %1319 = shalt.err (!%p1316_p7)
}
  0x20   : > { %s1320_s23 = scalar_lea.vmem %s1631_s19, 1024  ;;  %p1328_p2 = scmp.lt.s32.totalorder %s1631_s19, %s1631_s19 }
  0x21   : > { %p1321_p9 = scmp.ne.s32.totalorder %s1631_s19, %s1320_s23  ;;  %p1329_p6 = scmp.lt.s32.totalorder %s1320_s23, %s1320_s23 }
  0x23   : > { %p1323_p10 = pnand %p1321_p9, %p1654_p13  ;;  %p1330_p12 = por %p1329_p6, %p1328_p2 }
  0x25   : > { %p1324_p1 = pneg %p1323_p10 }
  0x27   : > { %p1331_p0 = pnand %p1330_p12, %p1324_p1 }
  0x29   : > { %1334 = shalt.err (!%p1331_p0)
}
  0x2a   : > { %s1528_s25 = smov 64   ;;  %s1529_s26 = smov 4  }
  0x2b   : > { %1204 = dma.hbm_to_vmem [thread:$0]  (!%p1638_p11), %s1936_s1, 1024, %s1631_s19, [#allocation6], %s1528_s25, %s1528_s25, %s1529_s26  }
  0x2c   : > { %s1335_s21 = scalar_lea.hbm %s1940_s5, 1024 }
  0x2d   : > { %p1336_p1 = scmp.ne.s32.totalorder %s1940_s5, %s1335_s21  ;;  %p1342_p10 = scmp.lt.u32.totalorder %s1335_s21, %s1940_s5 }
  0x2f   : > { %p1338_p2 = pnand %p1336_p1, %p1654_p13 }
  0x31   : > { %p1339_p6 = pneg %p1338_p2 }
  0x33   : > { %p1344_p3 = pnand %p1342_p10, %p1339_p6 }
  0x35   : > { %1347 = shalt.err (!%p1344_p3)
}
  0x36   : > { %s1348_s19 = scalar_lea.vmem %s1642_s22, 1024  ;;  %p1356_p12 = scmp.lt.s32.totalorder %s1642_s22, %s1642_s22 }
  0x37   : > { %p1349_p5 = scmp.ne.s32.totalorder %s1642_s22, %s1348_s19  ;;  %p1357_p0 = scmp.lt.s32.totalorder %s1348_s19, %s1348_s19 }
  0x39   : > { %p1351_p7 = pnand %p1349_p5, %p1654_p13  ;;  %p1358_p1 = por %p1357_p0, %p1356_p12 }
  0x3b   : > { %p1352_p9 = pneg %p1351_p7 }
  0x3d   : > { %p1359_p2 = pnand %p1358_p1, %p1352_p9 }
  0x3f   : > { %1362 = shalt.err (!%p1359_p2)
}
  0x40   : > { %1210 = dma.hbm_to_vmem [thread:$0]  (!%p1638_p11), %s1940_s5, 1024, %s1642_s22, [#allocation9], %s1528_s25, %s1528_s25, %s1529_s26  }
  0x41   : > { %s1363_s28 = scalar_lea.hbm %s1938_s3, 1024 }
  0x42   : > { %p1364_p6 = scmp.ne.s32.totalorder %s1938_s3, %s1363_s28  ;;  %p1370_p5 = scmp.lt.u32.totalorder %s1363_s28, %s1938_s3 }
  0x44   : > { %p1366_p10 = pnand %p1364_p6, %p1654_p13 }
  0x46   : > { %p1367_p3 = pneg %p1366_p10 }
  0x48   : > { %p1372_p7 = pnand %p1370_p5, %p1367_p3 }
  0x4a   : > { %1375 = shalt.err (!%p1372_p7)
}
  0x4b   : > { %s1376_s19 = scalar_lea.vmem %s281_s24, 1024  ;;  %p1384_p1 = scmp.lt.s32.totalorder %s281_s24, %s281_s24 }
  0x4c   : > { %p1377_p9 = scmp.ne.s32.totalorder %s281_s24, %s1376_s19  ;;  %p1385_p2 = scmp.lt.s32.totalorder %s1376_s19, %s1376_s19 }
  0x4e   : > { %p1379_p12 = pnand %p1377_p9, %p1654_p13  ;;  %p1386_p4 = por %p1385_p2, %p1384_p1 }
  0x50   : > { %p1380_p0 = pneg %p1379_p12 }
  0x52   : > { %p1387_p8 = pnand %p1386_p4, %p1380_p0 }
  0x54   : > { %1390 = shalt.err (!%p1387_p8)
}
  0x55   : > { %1207 = dma.hbm_to_vmem [thread:$0]  (!%p1638_p11), %s1938_s3, 1024, %s281_s24, [#allocation6], %s1528_s25, %s1528_s25, %s1529_s26  }
  0x56   : > { %s1530_s30 = smov [#allocation10]   ;;  %s1391_s29 = scalar_lea.hbm %s1942_s7, 1024 }
  0x57   : > { %s312_s16 = sshll.u32 %s1530_s30, 4  ;;  %p1392_p4 = scmp.ne.s32.totalorder %s1942_s7, %s1391_s29  ;;  %s313_s16 = int_to_ptr.vmem [resolvable:$true] %s312_s16 }
  0x58   : > { %p1398_p10 = scmp.lt.u32.totalorder %s1391_s29, %s1942_s7 }
  0x59   : > { %p1394_p8 = pnand %p1392_p4, %p1654_p13 }
  0x5b   : > { %p1395_p6 = pneg %p1394_p8 }
  0x5d   : > { %p1400_p3 = pnand %p1398_p10, %p1395_p6 }
  0x5f   : > { %1403 = shalt.err (!%p1400_p3)
}
  0x60   : > { %s1404_s24 = scalar_lea.vmem %s313_s16, 1024  ;;  %p1412_p12 = scmp.lt.s32.totalorder %s313_s16, %s313_s16 }
  0x61   : > { %p1405_p5 = scmp.ne.s32.totalorder %s313_s16, %s1404_s24  ;;  %p1413_p0 = scmp.lt.s32.totalorder %s1404_s24, %s1404_s24 }
  0x63   : > { %p1407_p7 = pnand %p1405_p5, %p1654_p13  ;;  %p1414_p1 = por %p1413_p0, %p1412_p12 }
  0x65   : > { %p1408_p9 = pneg %p1407_p7 }
  0x67   : > { %p1415_p2 = pnand %p1414_p1, %p1408_p9 }
  0x69   : > { %1418 = shalt.err (!%p1415_p2)
}
  0x6a   : > { %1213 = dma.hbm_to_vmem [thread:$0]  (!%p1638_p11), %s1942_s7, 1024, %s313_s16, [#allocation9], %s1528_s25, %s1528_s25, %s1529_s26  }
  0x6b   : > { %s1748_s14 = sadd.s32 1, %s1523_s12   ;;  %s34_s20 = sadd.s32 1, %s1519_s11 }
  0x6c   : > { %s31_s30 = ssub.s32 %s1523_s12, %s1748_s14  ;;  %p41_p13 = scmp.ne.s32.totalorder %s1519_s11, %s1515_s10 }
  0x6d   : > { %p32_p4 = scmp.eq.s32.totalorder %s31_s30, 0  ;;  %p42_p8 = scmp.eq.s32.totalorder %s1523_s12, 0 }
  0x6e   : > { %p1959_p6 = scmp.eq.s32.totalorder %s1608_s13, 1  ;;  %p1226_p3 = scmp.lt.s32.totalorder %s1523_s12, 2 }
  0x6f   : > { %s1764_s28 = scalar_select %p32_p4, %s1519_s11, %s34_s20  }
  0x70   : > { %p1758_p10 = por %p1959_p6, %p41_p13  ;;  %p43_p5 = por %p42_p8, %p41_p13 }
  0x71   : > { %s329_s29 = sand.u32 1, %s1519_s11   ;;  %s1063_s16 = sshll.u32 %s1523_s12, 7 }
  0x72   : > { %s1011_s18 = sshll.u32 %s329_s29, 3  ;;  %s1771_s19 = scalar_lea.hbm %s1935_s0, %s1063_s16 }
  0x73   : > { %s333_s24 = scalar_lea.vmem [#allocation2], %s1011_s18  ;;  %p1775_p11 = pnand %p1226_p3, %p43_p5 }
  0x74   : > { %s340_s22 = sshll.u32 %s333_s24, 4  ;;  %s1779_s20 = scalar_lea.sflag [#allocation3], %s329_s29  ;;  %s1773_s22 = int_to_ptr.vmem [resolvable:$true] %s340_s22 }
  0x75   : > { %s1419_s30 = scalar_lea.hbm %s1771_s19, 128  ;;  %p1421_p9 = pneg %p1775_p11 }
  0x76   : > { %p1420_p7 = scmp.ne.s32.totalorder %s1771_s19, %s1419_s30  ;;  %s1424_s21 = scalar_lea.hbm %s1935_s0, 256 }
  0x77   : > { %p1425_p1 = scmp.lt.u32.totalorder %s1771_s19, %s1935_s0  ;;  %p1426_p2 = scmp.lt.u32.totalorder %s1424_s21, %s1419_s30 }
  0x78   : > { %p1422_p12 = pnand %p1421_p9, %p1420_p7  ;;  %p1428_p4 = scmp.lt.u32.totalorder %s1419_s30, %s1771_s19 }
  0x79   : > { %p1427_p13 = por %p1426_p2, %p1425_p1 }
  0x7a   : > { %p1423_p0 = pneg %p1422_p12 }
  0x7b   : > { %p1429_p8 = por %p1428_p4, %p1427_p13 }
  0x7d   : > { %p1430_p6 = pnand %p1429_p8, %p1423_p0 }
  0x7f   : > { %1433 = shalt.err (!%p1430_p6)
}
  0x80   : > { %s1434_s29 = scalar_lea.vmem %s1773_s22, 128  ;;  %s1531_s18 = smov [#allocation2]  }
  0x81   : > { %p1435_p3 = scmp.ne.s32.totalorder %s1773_s22, %s1434_s29  ;;  %s1439_s16 = sshll.u32 %s1531_s18, 4  ;;  %s1440_s16 = int_to_ptr.vmem [resolvable:$false] %s1439_s16 }
  0x82   : > { %s1441_s23 = scalar_lea.vmem %s1440_s16, 256  ;;  %p1442_p12 = scmp.lt.s32.totalorder %s1773_s22, %s1440_s16 }
  0x83   : > { %p1437_p5 = pnand %p1435_p3, %p1421_p9  ;;  %p1443_p1 = scmp.lt.s32.totalorder %s1441_s23, %s1434_s29 }
  0x85   : > { %p1438_p7 = pneg %p1437_p5  ;;  %p1444_p2 = por %p1443_p1, %p1442_p12 }
  0x87   : > { %p1445_p13 = pnand %p1444_p2, %p1438_p7 }
  0x89   : > { %1448 = shalt.err (!%p1445_p13)
}
  0x8a   : > { %1217 = dma.hbm_to_vmem [thread:$0]  (!%p1775_p11), %s1771_s19, 128, %s1773_s22, %s1779_s20, %s1528_s25, %s1528_s25, %s1529_s26  }
  0x8b   : > { %p1962_p9 = scmp.ne.s32.totalorder %s1956_s17, 0 }
  0x8c   : > { %s1813_s30 = sand.u32 (!%p1962_p9), 1, %s1515_s10   ;;  %p1963_p0 = scmp.ne.s32.totalorder (!%p1962_p9), %s1953_s15, 0 }
  0x8d   : > { %352 = sbr.rel (%p1962_p9) target bundleno = 1081 (0x439), region = 56  ;;  %s1015_s21 = sshll.u32 (!%p1962_p9), %s1813_s30, 3 }
  0x8e   : > { %s355_s24 = scalar_lea.sflag (!%p1962_p9), [#allocation3], %s1813_s30  ;;  %s1817_s29 = scalar_lea.vmem (!%p1962_p9), [#allocation2], %s1015_s21 }
  0x94   : > { %1494 = dma.done.wait (%p1963_p0), %s355_s24, 128  }
  0x95   : > { %1496 = vsyncadd (%p1963_p0), %s355_s24, 4294967168  ;;  %p1964_p11 = scmp.eq.s32.totalorder %s1608_s13, 0 }
  0x97   : > { %1498 = dma.done.wait (%p1964_p11), [#allocation6], 2048   ;;  %p1965_p4 = pmov %p1964_p11 }
  0x99   : > { %1500 = vsyncadd (%p1965_p4), [#allocation6], 4294965248  ;;  %p1966_p8 = pmov %p1965_p4 }
  0x9a   : > { %p1967_p6 = pmov %p1965_p4 }
  0x9b   : > { %1502 = dma.done.wait (%p1966_p8), [#allocation9], 2048  }
  0x9c   : > { %1504 = vsyncadd (%p1967_p6), [#allocation9], 4294965248  ;;  %v1532_v0 = vmov 0.0   ;;  %vm1533_vm0 = vmmov 0   ;;  %v1274_v1 = vld [vmem:[#allocation5] sm:$0xff]   ;;  %v1275_v2 = vld [vmem:[#allocation5 + $0x8] sm:$0xff]  }
  0x9d   : > { %1101 = vmatprep.subr.bf16.mxu0 %v1532_v0  ;;  %1117 = vmatprep.mubr.msk.bf16.mxu0 %vm1533_vm0, %v1532_v0  ;;  %v1276_v3 = vld [vmem:[#allocation5 + $0x10] sm:$0xff]   ;;  %v1283_v4 = vld [vmem:[#allocation7] sm:$0xff]   ;;  %v1277_v5 = vld [vmem:[#allocation5 + $0x18] sm:$0xff]   ;;  %s1020_s9 = sshll.u32 %s1813_s30, 4  ;;  %s1064_s21 = sshll.u32 %s1608_s13, 8 }
  0x9e   : > { %1121 = vmatprep.subr.bf16.mxu1 %v1532_v0  ;;  %1137 = vmatprep.mubr.msk.bf16.mxu1 %vm1533_vm0, %v1532_v0  ;;  %v1284_v6 = vld [vmem:[#allocation7 + $0x8] sm:$0xff]   ;;  %v1278_v7 = vld [vmem:[#allocation5 + $0x20] sm:$0xff]   ;;  %v1285_v8 = vld [vmem:[#allocation7 + $0x10] sm:$0xff]   ;;  %s408_s16 = scalar_lea.vmem [#allocation11], %s1020_s9  ;;  %s1968_s15 = sld [smem:[#allocation18_spill]] }
  0x9f   : > { %1102 = vmatpush3.bf16.msra.mxu0 %v1274_v1  ;;  %1122 = vmatpush3.bf16.msra.mxu1 %v1283_v4  ;;  %v1279_v9 = vld [vmem:[#allocation5 + $0x28] sm:$0xff]   ;;  %v1286_v10 = vld [vmem:[#allocation7 + $0x18] sm:$0xff]   ;;  %v1280_v11 = vld [vmem:[#allocation5 + $0x30] sm:$0xff]   ;;  %s893_s23 = sshll.u32 %s408_s16, 4  ;;  %s880_s25 = scalar_lea.sflag [#allocation4], %s1813_s30  ;;  %s1886_s23 = int_to_ptr.vmem [resolvable:$true] %s893_s23 }
  0xa0   : > { %1103 = vmatprep.subr.bf16.mxu0 %v1532_v0  ;;  %1123 = vmatprep.subr.bf16.mxu1 %v1532_v0  ;;  %v1287_v12 = vld [vmem:[#allocation7 + $0x20] sm:$0xff]   ;;  %v1281_v13 = vld [vmem:[#allocation5 + $0x38] sm:$0xff]   ;;  %v1288_v14 = vld [vmem:[#allocation7 + $0x28] sm:$0xff]   ;;  %s1449_s13 = scalar_lea.vmem %s1886_s23, 256  ;;  %s1534_s26 = smov [#allocation11]  }
  0xa1   : > { %v1282_v15 = vld [vmem:[%s1817_s29] sm:$0xff]   ;;  %v1291_v18 = vld [vmem:[#allocation8] sm:$0xff]   ;;  %v1292_v19 = vld [vmem:[#allocation8 + $0x8] sm:$0xff]   ;;  %p1450_p3 = scmp.ne.s32.totalorder %s1886_s23, %s1449_s13  ;;  %s1453_s19 = sshll.u32 %s1534_s26, 4  ;;  %s1454_s19 = int_to_ptr.vmem [resolvable:$false] %s1453_s19 }
  0xa2   : > { %v1289_v16 = vld [vmem:[#allocation7 + $0x30] sm:$0xff]   ;;  %v1290_v17 = vld [vmem:[#allocation7 + $0x38] sm:$0xff]   ;;  %v1295_v22 = vld [vmem:[#allocation8 + $0x20] sm:$0xff]   ;;  %s1455_s22 = scalar_lea.vmem %s1454_s19, 512  ;;  %p1456_p12 = scmp.lt.s32.totalorder %s1886_s23, %s1454_s19 }
  0xa3   : > { %1104 = vmatpush3.bf16.msra.mxu0 %v1275_v2  ;;  %1124 = vmatpush3.bf16.msra.mxu1 %v1284_v6  ;;  %v1293_v20 = vld [vmem:[#allocation8 + $0x10] sm:$0xff]   ;;  %v1294_v21 = vld [vmem:[#allocation8 + $0x18] sm:$0xff]   ;;  %v1296_v23 = vld [vmem:[#allocation8 + $0x28] sm:$0xff]   ;;  %p1451_p5 = pnand %p1450_p3, %p1758_p10  ;;  %p1457_p1 = scmp.lt.s32.totalorder %s1455_s22, %s1449_s13 }
  0xa4   : > { %1105 = vmatprep.subr.bf16.mxu0 %v1532_v0  ;;  %1125 = vmatprep.subr.bf16.mxu1 %v1532_v0  ;;  %v1021_v24 = vld [vmem:[%s1937_s2] ss:$0 sm:$0xff]  ;;  %v1298_v35 = vld [vmem:[#allocation8 + $0x38] sm:$0xff]   ;;  %v1299_v36 = vld [vmem:[#allocation10] sm:$0xff]   ;;  %s1891_s17 = scalar_lea.hbm %s1968_s15, %s1064_s21 }
  0xa5   : > { %v1297_v34 = vld [vmem:[#allocation8 + $0x30] sm:$0xff]   ;;  %v1300_v37 = vld [vmem:[#allocation10 + $0x8] sm:$0xff]   ;;  %v1302_v39 = vld [vmem:[#allocation10 + $0x18] sm:$0xff]   ;;  %p1452_p7 = pneg %p1451_p5  ;;  %p1458_p2 = por %p1457_p1, %p1456_p12 }
  0xa6   : > { %v1301_v38 = vld [vmem:[#allocation10 + $0x10] sm:$0xff]   ;;  %v1303_v40 = vld [vmem:[#allocation10 + $0x20] sm:$0xff]   ;;  %v1304_v41 = vld [vmem:[#allocation10 + $0x28] sm:$0xff]  }
  0xa7   : > { %1106 = vmatpush3.bf16.msra.mxu0 %v1276_v3  ;;  %1126 = vmatpush3.bf16.msra.mxu1 %v1285_v8  ;;  %v1031_v42 = vld [vmem:[%s1939_s4] ss:$0 sm:$0xff]  ;;  %v1306_v53 = vld [vmem:[#allocation10 + $0x38] sm:$0xff]   ;;  %p1459_p13 = pnand %p1458_p2, %p1452_p7 }
  0xa8   : > { %1107 = vmatprep.subr.bf16.mxu0 %v1532_v0  ;;  %1127 = vmatprep.subr.bf16.mxu1 %v1532_v0  ;;  %v1305_v52 = vld [vmem:[#allocation10 + $0x30] sm:$0xff]  }
  0xa9   : > { %v1040_v54 = vld [vmem:[%s1941_s6] ss:$0 sm:$0xff] }
  0xab   : > { %1108 = vmatpush3.bf16.msra.mxu0 %v1277_v5  ;;  %1128 = vmatpush3.bf16.msra.mxu1 %v1286_v10 }
  0xac   : > { %1109 = vmatprep.subr.bf16.mxu0 %v1532_v0  ;;  %1129 = vmatprep.subr.bf16.mxu1 %v1532_v0 }
  0xaf   : > { %1110 = vmatpush3.bf16.msra.mxu0 %v1278_v7  ;;  %1130 = vmatpush3.bf16.msra.mxu1 %v1287_v12 }
  0xb0   : > { %1111 = vmatprep.subr.bf16.mxu0 %v1532_v0  ;;  %1131 = vmatprep.subr.bf16.mxu1 %v1532_v0 }
  0xb3   : > { %1112 = vmatpush3.bf16.msra.mxu0 %v1279_v9  ;;  %1132 = vmatpush3.bf16.msra.mxu1 %v1288_v14 }
  0xb4   : > { %1113 = vmatprep.subr.bf16.mxu0 %v1532_v0  ;;  %1133 = vmatprep.subr.bf16.mxu1 %v1532_v0 }
  0xb7   : > { %1114 = vmatpush3.bf16.msra.mxu0 %v1280_v11  ;;  %1134 = vmatpush3.bf16.msra.mxu1 %v1289_v16 }
  0xb8   : > { %1115 = vmatprep.subr.bf16.mxu0 %v1532_v0  ;;  %1135 = vmatprep.subr.bf16.mxu1 %v1532_v0 }
  0xbb   : > { %1116 = vmatpush3.bf16.msra.mxu0 %v1281_v13  ;;  %1136 = vmatpush3.bf16.msra.mxu1 %v1290_v17 }
  0xbc   : > { %1141 = vmatprep.subr.bf16.mxu0 %v1532_v0  ;;  %1161 = vmatprep.subr.bf16.mxu1 %v1532_v0 }
  0xbe   : > { %1118 = vmatmul.mubr.bf16.vlgmr.msra.gmra.mrb[0].mxu0 %v1282_v15 }
  0xbf   : > { %1157 = vmatprep.mubr.msk.bf16.mxu0 %vm1533_vm0, %v1532_v0  ;;  %1142 = vmatpush3.bf16.msra.mxu0 %v1291_v18 }
  0xc0   : > { %1143 = vmatprep.subr.bf16.mxu0 %v1532_v0 }
  0xc3   : > { %1144 = vmatpush3.bf16.msra.mxu0 %v1292_v19 }
  0xc4   : > { %1145 = vmatprep.subr.bf16.mxu0 %v1532_v0 }
  0xc7   : > { %1146 = vmatpush3.bf16.msra.mxu0 %v1293_v20 }
  0xc8   : > { %1147 = vmatprep.subr.bf16.mxu0 %v1532_v0 }
  0xcb   : > { %1148 = vmatpush3.bf16.msra.mxu0 %v1294_v21 }
  0xcc   : > { %1149 = vmatprep.subr.bf16.mxu0 %v1532_v0 }
  0xcf   : > { %1150 = vmatpush3.bf16.msra.mxu0 %v1295_v22 }
  0xd0   : > { %1151 = vmatprep.subr.bf16.mxu0 %v1532_v0 }
  0xd3   : > { %1152 = vmatpush3.bf16.msra.mxu0 %v1296_v23 }
  0xd4   : > { %1153 = vmatprep.subr.bf16.mxu0 %v1532_v0 }
  0xd7   : > { %1154 = vmatpush3.bf16.msra.mxu0 %v1297_v34 }
  0xd8   : > { %1155 = vmatprep.subr.bf16.mxu0 %v1532_v0 }
  0xdb   : > { %1156 = vmatpush3.bf16.msra.mxu0 %v1298_v35 }
 0x191   : > { %v525_v25 = vpop.f32.mrb[0].mxu0 }
 0x192   : > { %v526_v26 = vadd.f32 %v1021_v24, %v525_v25  ;;  %v1119_v27 = vpop.f32.mrb[1].mxu0 }
 0x193   : > { %v528_v28 = vpop.f32.mrb[2].mxu0 }
 0x194   : > { %v529_v29 = vadd.f32 %v1021_v24, %v528_v28  ;;  %v1120_v30 = vpop.f32.mrb[3].mxu0  ;;  %v532_v31 = vmax.f32 %v526_v26, 0.0 }
 0x196   : > { %v533_v32 = vmax.f32 %v529_v29, 0.0 }
 0x198   : > { %v534_v33 = vpack.c.bf16 %v533_v32, %v532_v31 }
 0x19a   : > { %1138 = vmatmul.mubr.bf16.vlgmr.msra.gmra.mrb[0].mxu1 %v534_v33 }
 0x19b   : > { %1177 = vmatprep.mubr.msk.bf16.mxu1 %vm1533_vm0, %v1532_v0  ;;  %1162 = vmatpush3.bf16.msra.mxu1 %v1299_v36 }
 0x19c   : > { %1163 = vmatprep.subr.bf16.mxu1 %v1532_v0 }
 0x19f   : > { %1164 = vmatpush3.bf16.msra.mxu1 %v1300_v37 }
 0x1a0   : > { %1165 = vmatprep.subr.bf16.mxu1 %v1532_v0 }
 0x1a3   : > { %1166 = vmatpush3.bf16.msra.mxu1 %v1301_v38 }
 0x1a4   : > { %1167 = vmatprep.subr.bf16.mxu1 %v1532_v0 }
 0x1a7   : > { %1168 = vmatpush3.bf16.msra.mxu1 %v1302_v39 }
 0x1a8   : > { %1169 = vmatprep.subr.bf16.mxu1 %v1532_v0 }
 0x1ab   : > { %1170 = vmatpush3.bf16.msra.mxu1 %v1303_v40 }
 0x1ac   : > { %1171 = vmatprep.subr.bf16.mxu1 %v1532_v0 }
 0x1af   : > { %1172 = vmatpush3.bf16.msra.mxu1 %v1304_v41 }
 0x1b0   : > { %1173 = vmatprep.subr.bf16.mxu1 %v1532_v0 }
 0x1b3   : > { %1174 = vmatpush3.bf16.msra.mxu1 %v1305_v52 }
 0x1b4   : > { %1175 = vmatprep.subr.bf16.mxu1 %v1532_v0  ;;  %v1049_v0 = vld [vmem:[%s1943_s8] ss:$0 sm:$0xff] }
 0x1b7   : > { %1176 = vmatpush3.bf16.msra.mxu1 %v1306_v53 }
 0x26d   : > { %v640_v43 = vpop.f32.mrb[0].mxu1 }
 0x26e   : > { %v641_v44 = vadd.f32 %v1031_v42, %v640_v43  ;;  %v1139_v45 = vpop.f32.mrb[1].mxu1 }
 0x26f   : > { %v643_v46 = vpop.f32.mrb[2].mxu1 }
 0x270   : > { %v644_v47 = vadd.f32 %v1031_v42, %v643_v46  ;;  %v1140_v48 = vpop.f32.mrb[3].mxu1  ;;  %v647_v49 = vmax.f32 %v641_v44, 0.0 }
 0x272   : > { %v648_v50 = vmax.f32 %v644_v47, 0.0 }
 0x274   : > { %v649_v51 = vpack.c.bf16 %v648_v50, %v647_v49 }
 0x276   : > { %1158 = vmatmul.mubr.bf16.vlgmr.msra.gmra.mrb[4].mxu0 %v649_v51 }
 0x349   : > { %v755_v55 = vpop.f32.mrb[4].mxu0 }
 0x34a   : > { %v756_v56 = vadd.f32 %v1040_v54, %v755_v55  ;;  %v1159_v57 = vpop.f32.mrb[5].mxu0 }
 0x34b   : > { %v758_v58 = vpop.f32.mrb[6].mxu0 }
 0x34c   : > { %v759_v59 = vadd.f32 %v1040_v54, %v758_v58  ;;  %v1160_v60 = vpop.f32.mrb[7].mxu0  ;;  %v762_v61 = vmax.f32 %v756_v56, 0.0 }
 0x34e   : > { %v763_v62 = vmax.f32 %v759_v59, 0.0 }
 0x350   : > { %v764_v63 = vpack.c.bf16 %v763_v62, %v762_v61 }
 0x352   : > { %1178 = vmatmul.mubr.bf16.vlgmr.msra.gmra.mrb[4].mxu1 %v764_v63 }
 0x425   : > { %v870_v1 = vpop.f32.mrb[4].mxu1 }
 0x426   : > { %v871_v2 = vadd.f32 %v1049_v0, %v870_v1  ;;  %v1179_v3 = vpop.f32.mrb[5].mxu1 }
 0x427   : > { %v873_v4 = vpop.f32.mrb[6].mxu1 }
 0x428   : > { %877 = vst [vmem:[%s408_s16] sm:$0xff] %v871_v2  ;;  %v874_v5 = vadd.f32 %v1049_v0, %v873_v4  ;;  %v1180_v6 = vpop.f32.mrb[7].mxu1 }
 0x42a   : > { %878 = vst [vmem:[%s408_s16 + $0x8] sm:$0xff] %v874_v5 }
 0x42b   : > { %1462 = shalt.err (!%p1459_p13)
}
 0x42c   : > { %s1463_s9 = scalar_lea.hbm %s1891_s17, 256  ;;  %s1467_s16 = scalar_lea.hbm %s1968_s15, 512 }
 0x42d   : > { %p1464_p9 = scmp.ne.s32.totalorder %s1891_s17, %s1463_s9  ;;  %p1468_p4 = scmp.lt.u32.totalorder %s1891_s17, %s1968_s15 }
 0x42e   : > { %p1469_p8 = scmp.lt.u32.totalorder %s1467_s16, %s1463_s9  ;;  %p1471_p3 = scmp.lt.u32.totalorder %s1463_s9, %s1891_s17 }
 0x42f   : > { %p1465_p0 = pnand %p1464_p9, %p1758_p10 }
 0x430   : > { %p1470_p6 = por %p1469_p8, %p1468_p4 }
 0x431   : > { %p1466_p11 = pneg %p1465_p0 }
 0x432   : > { %p1472_p5 = por %p1471_p3, %p1470_p6 }
 0x434   : > { %p1473_p7 = pnand %p1472_p5, %p1466_p11 }
 0x436   : > { %1476 = shalt.err (!%p1473_p7)
}
 0x437   : > { %s1535_s29 = smov 128   ;;  %s1536_s13 = smov 8  }
 0x438   : > { %1199 = dma.vmem_to_hbm [thread:$0]  (%p1758_p10), %s1886_s23, 256, %s1891_s17, %s880_s25, %s1535_s29, %s1535_s29, %s1536_s13  }
 0x439 PF: > { %s1969_s26 = sld [smem:[#allocation16_spill]]  ;;  %s1970_s19 = sld [smem:[#allocation17_spill]] }
 0x43a   : > { %p1972_p1 = scmp.ge.s32.totalorder %s1523_s12, 2 }
 0x43f   : > { %s908_s22 = sand.u32 1, %s1969_s26   ;;  %p1971_p12 = scmp.ne.s32.totalorder %s1970_s19, 0 }
 0x440   : > { %s909_s9 = scalar_lea.sflag [#allocation4], %s908_s22 }
 0x441   : > { %p1219_p2 = pnand %p1972_p1, %p1971_p12 }
 0x443   : > { %1506 = dma.done.wait (!%p1219_p2), %s909_s9, 256  }
 0x444   : > { %1508 = vsyncadd (!%p1219_p2), %s909_s9, 4294967040  ;;  %p24_p13 = scmp.ge.s32.totalorder %s1748_s14, 4   ;;  %s1973_s30 = smov %s1515_s10 }
 0x445   : > { %s1974_s10 = smov %s1519_s11  ;;  %s1975_s11 = smov %s1764_s28 }
 0x446   : > { %s1976_s12 = smov %s1748_s14  ;;  %26 = sbr.rel (!%p24_p13) target bundleno = 9 (0x9), region = 117 }
 0x44d   :  { %914 = vsyncpa [#allocation3], 1 }
 0x44e   :  { %916 = vsyncpa [#allocation3 + $0x1], 1 }
 0x44f   :  { %917 = vsyncpa [#allocation6], 1 }
 0x450   :  { %918 = vsyncpa [#allocation9], 1 }
 0x451   :  { %919 = vsyncpa [#allocation4], 1 }
 0x452   :  { %921 = vsyncpa [#allocation4 + $0x1], 1 }

</bundles_post_ra>
